<compile_context>
chip_gen: v5e
topology: v5e:2x2
jax: 0.10.0
libtpu: 0.0.40
codegen_flags: <defaults>
</compile_context>

<pallas_src>
import jax
import jax.numpy as jnp
from jax.experimental import pallas as pl
from jax.experimental.pallas import tpu as pltpu


_LANE = 128                       # vreg lane width (last dim)
_SCALE_ROW_BYTES = _LANE * 4      # (rb, 1) f32 block lane-pads to rb*512 B/buffer
_MIN_GRID_STEPS = 8               # >= 2x TC count, lets in/out DMA overlap


def _sublane_unit(itemsize):
    """Native packed sublane tile: 8 for 4-byte, 16 for 2-byte, 32 for 1-byte."""
    return 8 * max(4 // int(itemsize), 1)


def _vmem_config():
    """(block budget, vmem_limit_bytes) tuned per TPU generation."""
    default_cap = 64 << 20
    try:
        info = pltpu.get_tpu_info()
        cap = int(getattr(info, "vmem_capacity_bytes", default_cap))
    except Exception:
        cap = default_cap
    if cap >= (100 << 20):        # v5e / v6e: 128 MiB physical per TensorCore
        return 48 << 20, 64 << 20
    # v7x (64 MiB per TC) or unknown: be conservative
    return 24 << 20, 40 << 20


_VMEM_BUDGET, _VMEM_LIMIT = _vmem_config()

_COMPILER_PARAMS = pltpu.CompilerParams(
    dimension_semantics=("parallel", "parallel"),
    vmem_limit_bytes=_VMEM_LIMIT)


# ---------------------------------------------------------------------------
# Trace-time tiling helpers (pure Python on static shapes).
# ---------------------------------------------------------------------------

def _aligned_divisors(dim, unit):
    """Block sizes for `dim` satisfying the tiling rule: multiples of `unit`
    that evenly divide `dim`, or the full extent when dim is not aligned."""
    if dim % unit == 0:
        k = dim // unit
        return [d * unit for d in range(1, k + 1) if k % d == 0]
    return [dim]


def _pick_tiles(rows, cols, bytes_per_elem, scale_row_bytes, sublane_unit,
                min_steps=_MIN_GRID_STEPS):
    """Pick an even-dividing, lane-dense (rb, lb) block.

    bytes_per_elem: summed itemsize of every (rb, lb) data block live in VMEM
      (all inputs + all outputs).
    scale_row_bytes: per-row bytes of the lane-padded (rb, 1) scale block
      (0 when the kernel has no scale operand).
    """
    row_opts = _aligned_divisors(rows, sublane_unit)
    col_opts = _aligned_divisors(cols, _LANE)

    def vmem(rb, lb):          # double-buffered footprint of all blocks
        return 2 * (rb * lb * bytes_per_elem + rb * scale_row_bytes)

    def steps(rb, lb):
        return (rows // rb) * (cols // lb)

    cands = [(rb, lb) for rb in row_opts for lb in col_opts
             if vmem(rb, lb) <= _VMEM_BUDGET]
    if not cands:
        # TODO(synk): both dims misaligned AND huge -> even the smallest legal
        # block exceeds the budget; not reachable at the shapes this module
        # uses (will fail loudly at compile time if ever hit).
        cands = [(min(row_opts), min(col_opts))]

    enough = [c for c in cands if steps(*c) >= min_steps]
    if enough:
        # biggest block that still leaves >= min_steps grid steps: amortizes
        # the ~0.35 us per-step overhead while keeping both v7x TCs busy and
        # the input/output DMA pipeline overlapped.
        return max(enough, key=lambda c: (c[0] * c[1], c[1]))
    # tensor too small to reach min_steps: maximize step count instead; blocks
    # are tiny here so per-step overhead is negligible either way.
    return max(cands, key=lambda c: (steps(*c), c[1]))


def _specs(R, L, rb, lb, *, with_scale):
    data_spec = pl.BlockSpec((rb, lb), lambda i, j: (i, j))
    grid = (R // rb, L // lb)
    if with_scale:
        scale_spec = pl.BlockSpec((rb, 1), lambda i, j: (i, 0))
        return data_spec, scale_spec, grid
    return data_spec, None, grid


# ---------------------------------------------------------------------------
# Kernels.
# ---------------------------------------------------------------------------

def _scale_for(scale_ref, out_ref):
    """Scale values in the multiply dtype: native narrow dtype on bf16-VALU
    chips (sub-32-bit outputs), f32 otherwise."""
    s = scale_ref[...]                                   # (rb, 1) f32
    if jnp.dtype(out_ref.dtype).itemsize < 4:
        s = s.astype(out_ref.dtype)
    return s


def _sd_gen_x_kernel(scale_ref, x_ref, out_ref):
    # Implicit (rb,1) x (rb,lb) broadcast; no materialized full-block scale.
    s = _scale_for(scale_ref, out_ref)
    out_ref[...] = (x_ref[...] * s).astype(out_ref.dtype)


def _sd_gen_xh_kernel(scale_ref, x_ref, h_ref, ox_ref, oh_ref):
    sx = _scale_for(scale_ref, ox_ref)
    sh = _scale_for(scale_ref, oh_ref)
    ox_ref[...] = (x_ref[...] * sx).astype(ox_ref.dtype)
    oh_ref[...] = (h_ref[...] * sh).astype(oh_ref.dtype)


def _sd_apply_x_kernel(m_ref, x_ref, out_ref):
    out_ref[...] = (x_ref[...] * m_ref[...]).astype(out_ref.dtype)


def _sd_apply_xh_kernel(m_ref, x_ref, h_ref, ox_ref, oh_ref):
    m = m_ref[...]
    ox_ref[...] = (x_ref[...] * m).astype(ox_ref.dtype)
    oh_ref[...] = (h_ref[...] * m).astype(oh_ref.dtype)


# ---------------------------------------------------------------------------
# pallas_call wrappers.
# ---------------------------------------------------------------------------

@jax.jit
def _sd_generate(x, scale_col):
    """x: (N, C, H, W); scale_col: (N*C, 1) f32 -> x * scale (NCHW)."""
    N, C, H, W = x.shape
    R, L = N * C, H * W
    x2 = x.reshape(R, L)
    x_is = x.dtype.itemsize
    rb, lb = _pick_tiles(R, L, bytes_per_elem=2 * x_is,
                         scale_row_bytes=_SCALE_ROW_BYTES,
                         sublane_unit=_sublane_unit(x_is))
    data_spec, scale_spec, grid = _specs(R, L, rb, lb, with_scale=True)
    nbytes = R * L * x_is
    cost = pl.CostEstimate(flops=R * L, transcendentals=0,
                           bytes_accessed=2 * nbytes + 4 * R)
    out2 = pl.pallas_call(
        _sd_gen_x_kernel,
        grid=grid,
        in_specs=[scale_spec, data_spec],
        out_specs=data_spec,
        out_shape=jax.ShapeDtypeStruct((R, L), x.dtype),
        compiler_params=_COMPILER_PARAMS,
        cost_estimate=cost,
    )(scale_col, x2)
    return out2.reshape(x.shape)


@jax.jit
def _sd_generate_fused(x, h, scale_col):
    """Fused dropout of x and h (same shape) sharing one sweep / scale read."""
    N, C, H, W = x.shape
    R, L = N * C, H * W
    x2 = x.reshape(R, L)
    h2 = h.reshape(R, L)
    x_is, h_is = x.dtype.itemsize, h.dtype.itemsize
    rb, lb = _pick_tiles(R, L, bytes_per_elem=2 * x_is + 2 * h_is,
                         scale_row_bytes=_SCALE_ROW_BYTES,
                         sublane_unit=_sublane_unit(min(x_is, h_is)))
    data_spec, scale_spec, grid = _specs(R, L, rb, lb, with_scale=True)
    bytes_x = R * L * x_is
    bytes_h = R * L * h_is
    cost = pl.CostEstimate(flops=2 * R * L, transcendentals=0,
                           bytes_accessed=2 * bytes_x + 2 * bytes_h + 4 * R)
    ox2, oh2 = pl.pallas_call(
        _sd_gen_xh_kernel,
        grid=grid,
        in_specs=[scale_spec, data_spec, data_spec],
        out_specs=(data_spec, data_spec),
        out_shape=(jax.ShapeDtypeStruct((R, L), x.dtype),
                   jax.ShapeDtypeStruct((R, L), h.dtype)),
        compiler_params=_COMPILER_PARAMS,
        cost_estimate=cost,
    )(scale_col, x2, h2)
    return ox2.reshape(x.shape), oh2.reshape(h.shape)


@jax.jit
def _sd_apply(mask, x):
    """Elementwise x * mask (supplied full-size mask), output in x.dtype."""
    N, C, H, W = x.shape
    R, L = N * C, H * W
    x2 = x.reshape(R, L)
    m2 = mask.reshape(R, L)
    x_is, m_is = x.dtype.itemsize, mask.dtype.itemsize
    rb, lb = _pick_tiles(R, L, bytes_per_elem=2 * x_is + m_is,
                         scale_row_bytes=0,
                         sublane_unit=_sublane_unit(min(x_is, m_is)))
    data_spec, _, grid = _specs(R, L, rb, lb, with_scale=False)
    cost = pl.CostEstimate(flops=R * L, transcendentals=0,
                           bytes_accessed=R * L * (2 * x_is + m_is))
    out2 = pl.pallas_call(
        _sd_apply_x_kernel,
        grid=grid,
        in_specs=[data_spec, data_spec],
        out_specs=data_spec,
        out_shape=jax.ShapeDtypeStruct((R, L), x.dtype),
        compiler_params=_COMPILER_PARAMS,
        cost_estimate=cost,
    )(m2, x2)
    return out2.reshape(x.shape)


@jax.jit
def _sd_apply_fused(mask, x, h):
    """Fused supplied-full-mask multiply for x and h (same shape as mask)."""
    N, C, H, W = x.shape
    R, L = N * C, H * W
    x2 = x.reshape(R, L)
    h2 = h.reshape(R, L)
    m2 = mask.reshape(R, L)
    x_is, h_is, m_is = x.dtype.itemsize, h.dtype.itemsize, mask.dtype.itemsize
    rb, lb = _pick_tiles(R, L, bytes_per_elem=2 * x_is + 2 * h_is + m_is,
                         scale_row_bytes=0,
                         sublane_unit=_sublane_unit(min(x_is, h_is, m_is)))
    data_spec, _, grid = _specs(R, L, rb, lb, with_scale=False)
    cost = pl.CostEstimate(flops=2 * R * L, transcendentals=0,
                           bytes_accessed=R * L * (2 * x_is + 2 * h_is + m_is))
    ox2, oh2 = pl.pallas_call(
        _sd_apply_xh_kernel,
        grid=grid,
        in_specs=[data_spec, data_spec, data_spec],
        out_specs=(data_spec, data_spec),
        out_shape=(jax.ShapeDtypeStruct((R, L), x.dtype),
                   jax.ShapeDtypeStruct((R, L), h.dtype)),
        compiler_params=_COMPILER_PARAMS,
        cost_estimate=cost,
    )(m2, x2, h2)
    return ox2.reshape(x.shape), oh2.reshape(h.shape)


# ---------------------------------------------------------------------------
# Public API mirroring SpatialDropout.forward.
# ---------------------------------------------------------------------------

def spatial_dropout(x, h=None, mask=None, *, p=0.5, key=None, training=True,
                    full_mask=False):
    """Mirrors SpatialDropout.forward (NCHW).

    Returns (x_out, mask) or ((x_out, h_out), mask).  The tuple-input case of
    the PyTorch module corresponds to passing both `x` and `h`.

    By default the returned mask is the compact broadcastable (N, C, 1, 1) f32
    tensor (semantically equivalent to PyTorch's full mask under `mask * x`,
    but avoids a full-tensor HBM writeback).  Pass full_mask=True to get the
    PyTorch-shaped full-size f32 mask.
    """
    if not (0.0 <= p <= 1.0):
        raise ValueError(
            f"dropout probability has to be between 0 and 1, but got {p}")

    N, C = x.shape[0], x.shape[1]

    # ---- supplied-mask path: just elementwise multiply --------------------
    if mask is not None:
        if mask.shape == x.shape:
            if h is not None and h.shape == x.shape:
                x_out, h_out = _sd_apply_fused(mask, x, h)
                return (x_out, h_out), mask
            x_out = _sd_apply(mask, x)
            if h is not None:
                # TODO(synk): h shaped differently from x falls back to plain jnp.
                return (x_out, (mask * h).astype(h.dtype)), mask
            return x_out, mask
        if mask.size == N * C:
            # Compact per-channel mask (e.g. the default return of this fn).
            scale_col = mask.reshape(N * C, 1).astype(jnp.float32)
            if h is not None and h.shape == x.shape:
                x_out, h_out = _sd_generate_fused(x, h, scale_col)
                return (x_out, h_out), mask
            x_out = _sd_generate(x, scale_col)
            if h is not None:
                # TODO(synk): h shaped differently from x falls back to plain jnp.
                return (x_out, (mask * h).astype(h.dtype)), mask
            return x_out, mask
        # TODO(synk): arbitrary broadcast-shaped supplied masks fall back to jnp.
        x_out = (mask * x).astype(x.dtype)
        if h is not None:
            return (x_out, (mask * h).astype(h.dtype)), mask
        return x_out, mask

    # ---- generate-mask path (Dropout2d on a ones mask) --------------------
    if (not training) or p == 0.0:
        scale_col = jnp.ones((N * C, 1), jnp.float32)
    elif p == 1.0:
        scale_col = jnp.zeros((N * C, 1), jnp.float32)
    else:
        if key is None:
            raise ValueError("key must be provided when training with 0 < p < 1")
        keep = jax.random.bernoulli(key, 1.0 - p, (N * C, 1))
        scale_col = keep.astype(jnp.float32) * (1.0 / (1.0 - p))

    if full_mask:
        # PyTorch-shaped f32 mask; a cheap XLA broadcast-write, only on request.
        mask_out = jnp.broadcast_to(scale_col.reshape(N, C, 1, 1), x.shape)
    else:
        mask_out = scale_col.reshape(N, C, 1, 1)

    if h is not None and h.shape == x.shape:
        x_out, h_out = _sd_generate_fused(x, h, scale_col)
        return (x_out, h_out), mask_out

    x_out = _sd_generate(x, scale_col)
    if h is not None:
        # TODO(synk): h shaped differently from x falls back to plain jnp.
        return (x_out, (mask_out * h).astype(h.dtype)), mask_out
    return x_out, mask_out


if __name__ == "__main__":
    key = jax.random.PRNGKey(0)
    k_x, k_h, k_drop = jax.random.split(key, 3)

    N, C, H, W = 2, 4, 16, 16
    x = jax.random.normal(k_x, (N, C, H, W), dtype=jnp.float32)
    h = jax.random.normal(k_h, (N, C, H, W), dtype=jnp.float32)
    p = 0.5
    scale = 1.0 / (1.0 - p)

    # 1) single-input path, compact broadcastable mask (default)
    x_out, mask = spatial_dropout(x, p=p, key=k_drop)
    jax.block_until_ready((x_out, mask))
    assert mask.shape == (N, C, 1, 1), "compact mask has wrong shape"
    vals = mask.reshape(-1)
    assert bool(jnp.all((vals == 0.0) | (jnp.abs(vals - scale) < 1e-6))), "bad mask values"
    assert bool(jnp.allclose(x_out, mask * x, atol=1e-6)), "output != mask * x"

    # 2) full-mask opt-in (PyTorch-shaped), same key -> same decisions
    x_out_f, mask_full = spatial_dropout(x, p=p, key=k_drop, full_mask=True)
    jax.block_until_ready((x_out_f, mask_full))
    assert mask_full.shape == x.shape, "full mask has wrong shape"
    per_plane = mask_full.reshape(N, C, -1)
    assert bool(jnp.all(per_plane == per_plane[:, :, :1])), "mask not channel-constant"
    assert bool(jnp.allclose(per_plane[:, :, 0], mask.reshape(N, C))), "full/compact mask mismatch"
    assert bool(jnp.allclose(x_out_f, x_out, atol=1e-6)), "full-mask output mismatch"

    # 3) fused tuple-input (x, h) path — same key, so same mask
    (x_out2, h_out2), mask2 = spatial_dropout(x, h, p=p, key=k_drop)
    jax.block_until_ready((x_out2, h_out2, mask2))
    assert bool(jnp.allclose(mask2, mask, atol=1e-6)), "fused mask mismatch"
    assert bool(jnp.allclose(x_out2, mask * x, atol=1e-6)), "fused x output mismatch"
    assert bool(jnp.allclose(h_out2, mask * h, atol=1e-6)), "fused h output mismatch"

    # 4) supplied full-size mask -> dedicated apply kernel
    x_out3, _ = spatial_dropout(x, mask=mask_full, p=p)
    jax.block_until_ready(x_out3)
    assert bool(jnp.allclose(x_out3, x_out, atol=1e-6)), "supplied-full-mask output mismatch"

    # 5) supplied compact mask
    x_out4, _ = spatial_dropout(x, mask=mask, p=p)
    jax.block_until_ready(x_out4)
    assert bool(jnp.allclose(x_out4, x_out, atol=1e-6)), "supplied-compact-mask output mismatch"

    # 6) fused supplied full mask path
    (x_out5, h_out5), _ = spatial_dropout(x, h, mask=mask_full, p=p)
    jax.block_until_ready((x_out5, h_out5))
    assert bool(jnp.allclose(x_out5, mask * x, atol=1e-6)), "fused apply x mismatch"
    assert bool(jnp.allclose(h_out5, mask * h, atol=1e-6)), "fused apply h mismatch"

    # 7) eval mode: identity mask
    x_out6, mask6 = spatial_dropout(x, p=p, training=False)
    jax.block_until_ready((x_out6, mask6))
    assert bool(jnp.allclose(mask6, 1.0)), "eval mask not ones"
    assert bool(jnp.allclose(x_out6, x, atol=1e-6)), "eval output != x"

    print("KERNEL_OK")
</pallas_src>

<mosaic_0001>
module attributes {stable_mosaic.version = 11 : i64} {
  func.func @_sd_gen_x_kernel(%arg0: i32, %arg1: i32, %arg2: memref<8x1xf32, #tpu.memory_space<vmem>>, %arg3: memref<8x128xf32, #tpu.memory_space<vmem>>, %arg4: memref<8x128xf32, #tpu.memory_space<vmem>>) attributes {dimension_semantics = [#tpu.dimension_semantics<parallel>, #tpu.dimension_semantics<parallel>], iteration_bounds = array<i64: 1, 2>, scalar_prefetch = 0 : i64, scratch_operands = 0 : i64, tpu.core_type = #tpu.core_type<tc>, window_params = [{transform_indices = @transform_0, window_bounds = array<i64: 8, 1>}, {transform_indices = @transform_1, window_bounds = array<i64: 8, 128>}, {transform_indices = @transform_2, window_bounds = array<i64: 8, 128>}]} {
    %c0 = arith.constant 0 : index
    %c0_0 = arith.constant 0 : index
    %0 = vector.load %arg2[%c0, %c0_0] : memref<8x1xf32, #tpu.memory_space<vmem>>, vector<8x1xf32>
    %c0_1 = arith.constant 0 : index
    %c0_2 = arith.constant 0 : index
    %1 = vector.load %arg3[%c0_1, %c0_2] : memref<8x128xf32, #tpu.memory_space<vmem>>, vector<8x128xf32>
    %2 = vector.broadcast %0 : vector<8x1xf32> to vector<8x128xf32>
    %3 = arith.mulf %1, %2 : vector<8x128xf32>
    %c0_3 = arith.constant 0 : index
    %c0_4 = arith.constant 0 : index
    %4 = vector.load %arg4[%c0_3, %c0_4] : memref<8x128xf32, #tpu.memory_space<vmem>>, vector<8x128xf32>
    tpu.vector_store %arg4[%c0_3, %c0_4], %3 {strides = array<i32>} : memref<8x128xf32, #tpu.memory_space<vmem>>, vector<8x128xf32>,
    return
  }
  func.func @transform_0(%arg0: i32, %arg1: i32) -> (i32, i32) {
    %c0_i32 = arith.constant 0 : i32
    %c0_i32_0 = arith.constant 0 : i32
    return %arg0, %c0_i32 : i32, i32
  }
  func.func @transform_1(%arg0: i32, %arg1: i32) -> (i32, i32) {
    %c0_i32 = arith.constant 0 : i32
    return %arg0, %arg1 : i32, i32
  }
  func.func @transform_2(%arg0: i32, %arg1: i32) -> (i32, i32) {
    %c0_i32 = arith.constant 0 : i32
    return %arg0, %arg1 : i32, i32
  }
}

</mosaic_0001>

<bundles_post_ra>
// kernel: _sd_generate.1
= control target key start
LH: loop header
LB: loop body
LE: loop exit
PB: predicated region body
PF: predicated region fallthrough
CT: control target
= control target key end

     0   :  { %s376_s9 = smov 0   ;;  %s378_s10 = smov 0   ;;  %s400_s0 = inlined_call_operand.vmem [shape: f32[8,1], index: 0, kind: input, shape index: {}]   ;;  %s401_s1 = inlined_call_operand.vmem [shape: f32[8,256], index: 1, kind: input, shape index: {}]   ;;  %s402_s2 = inlined_call_operand.vmem [shape: f32[8,256], index: 2, kind: output, shape index: {}]  }
   0x1   :  { %s380_s11 = smov 0  }
   0x2 LB: > { %s21_s12 = sadd.s32 1, %s354_s10  ;;  %p305_p0 = scmp.ge.s32.totalorder %s358_s11, 1  ;;  %s358_s11 = sphi %s380_s11, %s12_s11   ;;  %s354_s10 = sphi %s378_s10, %s404_s10   ;;  %s350_s9 = sphi %s376_s9, %s403_s9  }
   0x3   : > { %p22_p1 = scmp.ge.s32.totalorder %s21_s12, 2  ;;  %p140_p2 = scmp.lt.s32.totalorder %s358_s11, 3 }
   0x5   : > { %s406_s12 = smov (%p22_p1, %s21_s12), 0  ;;  %p141_p3 = pnand %p305_p0, %p140_p2 }
   0x6   : > { %p178_p4 = scmp.lt.s32.totalorder (!%p141_p3), %s350_s9, 1 }
   0x7   : > { %144 = sbr.rel (%p141_p3) target bundleno = 132 (0x84), region = 28 }
   0xc   : > { %v192_v0 = vld [vmem:[%s400_s0] sm:$0xff]  ;;  %v360_v1 = vmov 0   ;;  %s408_s9 = smov (!%p178_p4, %s350_s9), 1 }
   0xd   : > { %335 = vset.pattern.permute.xlu0 %v360_v1  ;;  %s306_s15 = sshll.u32 %s408_s9, 3 }
   0xe   : > { %196 = vperm.xlu0 %335, %v192_v0   ;;  %s183_s18 = scalar_lea.vmem %s401_s1, %s306_s15  ;;  %s191_s21 = scalar_lea.vmem %s402_s2, %s306_s15 }
   0xf   : > { %v193_v2 = vld [vmem:[%s183_s18] sm:$0xff] }
  0x80   : > { %v197_v3 = vpop.permute.xlu0 %196 }
  0x81   : > { %v199_v4 = vmul.f32 %v197_v3, %v193_v2 }
  0x83   : > { %200 = vst [vmem:[%s191_s21] sm:$0xff] %v199_v4 }
  0x84 PF: > { %s12_s11 = sadd.s32 1, %s358_s11   ;;  %s403_s9 = smov %s354_s10 }
  0x85   : > { %p9_p5 = scmp.ge.s32.totalorder %s12_s11, 4   ;;  %s404_s10 = smov %s406_s12 }
  0x87   :  { %11 = sbr.rel (!%p9_p5) target bundleno = 2 (0x2), region = 61 }

</bundles_post_ra>
